<compile_context>
chip_gen: v5e
topology: v5e:2x2
jax: 0.10.0
libtpu: 0.0.40
codegen_flags: <defaults>
</compile_context>

<pallas_src>
import functools

import jax
import jax.numpy as jnp
from jax import lax
from jax.experimental import pallas as pl
from jax.experimental.pallas import tpu as pltpu


def _peep_lstm_kernel(tok_ref, table_ref, wh_ref, wph_ref, bp_ref, out_ref, *,
                      seq_length, hidden_dim):
    """tok_ref   : (seq, Bb, 1) int32 token ids in {0,1,2}
       table_ref : (3, 4H)      per-token input-side gate pre-activations (biases folded)
       wh_ref    : (H, 4H)      fused recurrent weights [W_ih | W_fh | W_oh | 0]
       wph_ref   : (H, Cp)      output projection (zero-padded to lane-dense Cp)
       bp_ref    : (1, Cp)      output bias (-1e30 in padded columns)
       out_ref   : (Bb, Cp)     log-softmax logits
    """
    H = hidden_dim
    Bb = out_ref.shape[0]
    wh = wh_ref[...]                       # (H, 4H): loaded once, reused every step
    row0 = table_ref[0:1, :]               # (1, 4H) hoisted static slices of the table
    row1 = table_ref[1:2, :]
    row2 = table_ref[2:3, :]
    zeros = jnp.zeros((Bb, H), jnp.float32)

    def step(t, carry):
        c, _ = carry
        tok = tok_ref[t]                   # (Bb, 1) int32
        # in-kernel embedding "gather": two VPU selects, off the serial MXU chain
        x_pre = jnp.where(tok == 0, row0, jnp.where(tok == 1, row1, row2))  # (Bb, 4H)
        # one fused MXU matmul per step (recurrent term for i/f/o; candidate cols are 0)
        pre = x_pre + jnp.dot(c, wh, preferred_element_type=jnp.float32)
        g = jax.nn.sigmoid(pre)            # single 4H-wide sigmoid instead of four
        i_t  = g[:, 0 * H:1 * H]
        f_t  = g[:, 1 * H:2 * H]
        o_t  = g[:, 2 * H:3 * H]
        cand = g[:, 3 * H:4 * H]           # sigmoid(x @ W_cx + b_c)
        c_new = cand * i_t + c * f_t
        h_new = jnp.tanh(c_new) * o_t
        return c_new, h_new

    unroll = True if seq_length <= 32 else 8
    _, h_t = lax.fori_loop(0, seq_length, step, (zeros, zeros), unroll=unroll)

    p_t = (jnp.dot(h_t, wph_ref[...], preferred_element_type=jnp.float32)
           + bp_ref[...])
    # stable log-softmax over the (lane-dense) class axis; padded cols carry -1e30
    m = jnp.max(p_t, axis=-1, keepdims=True)
    shifted = p_t - m
    lse = jnp.log(jnp.sum(jnp.exp(shifted), axis=-1, keepdims=True))
    out_ref[...] = shifted - lse


def peep_lstm_forward(x, params, *, seq_length, input_dim, hidden_dim,
                      num_classes, batch_size, block_batch=512):
    """x: (batch, seq_length, 1) int tokens in {0,1,2} — matches the PyTorch forward."""
    H = hidden_dim

    # --- tiny host-side precompute (all O(H^2) or smaller) ----------------------
    wx_cat = jnp.concatenate(
        [params["W_ix"], params["W_fx"], params["W_ox"], params["W_cx"]], axis=1)
    bx_cat = jnp.concatenate(
        [params["b_i"], params["b_f"], params["b_o"], params["b_c"]], axis=1)
    table = params["embedding"].astype(jnp.float32) @ wx_cat + bx_cat    # (3, 4H)

    # fused recurrent weights; zero block because the c-candidate gate has no
    # recurrent (peephole) term
    wh_cat = jnp.concatenate(
        [params["W_ih"], params["W_fh"], params["W_oh"],
         jnp.zeros((H, H), jnp.float32)], axis=1)                        # (H, 4H)

    # lane-dense classes: pad to multiple of 128; -1e30 bias in padded columns
    c_pad = max(128, -(-num_classes // 128) * 128)
    wph = jnp.pad(params["W_ph"], ((0, 0), (0, c_pad - num_classes)))
    bp = jnp.pad(params["b_p"], ((0, 0), (0, c_pad - num_classes)),
                 constant_values=-1e30)

    # batch blocking: >= 8 sublanes, <= block_batch rows per grid block
    b8 = -(-batch_size // 8) * 8
    block_b = min(block_batch, b8)
    b_pad = -(-batch_size // block_b) * block_b

    # tokens only (4 B/token instead of 4H*4 B/token); layout (seq, batch, 1)
    tok = jnp.transpose(x.astype(jnp.int32), (1, 0, 2))                  # (seq, batch, 1)
    if b_pad != batch_size:
        tok = jnp.pad(tok, ((0, 0), (0, b_pad - batch_size), (0, 0)))    # padded rows -> token 0

    kernel = functools.partial(_peep_lstm_kernel,
                               seq_length=seq_length, hidden_dim=H)

    out = pl.pallas_call(
        kernel,
        out_shape=jax.ShapeDtypeStruct((b_pad, c_pad), jnp.float32),
        grid_spec=pltpu.PrefetchScalarGridSpec(
            num_scalar_prefetch=0,
            grid=(b_pad // block_b,),
            in_specs=[
                pl.BlockSpec((seq_length, block_b, 1), lambda i: (0, i, 0)),  # tokens
                pl.BlockSpec((3, 4 * H), lambda i: (0, 0)),                   # table
                pl.BlockSpec((H, 4 * H), lambda i: (0, 0)),                   # wh
                pl.BlockSpec((H, c_pad), lambda i: (0, 0)),                   # W_ph (padded)
                pl.BlockSpec((1, c_pad), lambda i: (0, 0)),                   # b_p (padded)
            ],
            out_specs=pl.BlockSpec((block_b, c_pad), lambda i: (i, 0)),
        ),
        compiler_params=pltpu.CompilerParams(
            dimension_semantics=("parallel",)),
    )(tok, table, wh_cat, wph, bp)
    return out[:batch_size, :num_classes]


def init_params(key, *, input_dim, hidden_dim, num_classes):
    """Deterministic init mirroring the PyTorch module's __init__ shapes."""
    keys = jax.random.split(key, 16)
    ki = iter(range(16))

    def kaiming(k, shape):
        # kaiming_normal_(nonlinearity='linear'), PyTorch fan_in = shape[1]
        std = 1.0 / jnp.sqrt(jnp.float32(shape[1]))
        return (jax.random.normal(k, shape, jnp.float32) * std).astype(jnp.float32)

    p = {}
    for gate in ["i", "f", "o"]:
        p[f"W_{gate}h"] = kaiming(keys[next(ki)], (hidden_dim, hidden_dim))
        p[f"W_{gate}x"] = kaiming(keys[next(ki)], (input_dim, hidden_dim))
        p[f"b_{gate}"] = jnp.zeros((1, hidden_dim), jnp.float32)
    p["W_cx"] = kaiming(keys[next(ki)], (input_dim, hidden_dim))
    p["b_c"] = jnp.zeros((1, hidden_dim), jnp.float32)
    p["W_ph"] = kaiming(keys[next(ki)], (hidden_dim, num_classes))
    p["b_p"] = jnp.zeros((1, num_classes), jnp.float32)
    # nn.Embedding(3, input_dim) default init: N(0, 1)
    p["embedding"] = jax.random.normal(keys[next(ki)], (3, input_dim), jnp.float32)
    return p


def peep_lstm_reference(x, params, *, seq_length, hidden_dim, batch_size):
    """Pure-JAX reference of the PyTorch forward (for correctness checking)."""
    tokens = x[..., 0]
    c_t = jnp.zeros((batch_size, hidden_dim), jnp.float32)
    h_t = jnp.zeros((batch_size, hidden_dim), jnp.float32)
    for t in range(seq_length):
        x_em = jnp.take(params["embedding"], tokens[:, t], axis=0)
        i_t = jax.nn.sigmoid(x_em @ params["W_ix"] + c_t @ params["W_ih"] + params["b_i"])
        f_t = jax.nn.sigmoid(x_em @ params["W_fx"] + c_t @ params["W_fh"] + params["b_f"])
        o_t = jax.nn.sigmoid(x_em @ params["W_ox"] + c_t @ params["W_oh"] + params["b_o"])
        c_t = jax.nn.sigmoid(x_em @ params["W_cx"] + params["b_c"]) * i_t + c_t * f_t
        h_t = jnp.tanh(c_t) * o_t
    p_t = h_t @ params["W_ph"] + params["b_p"]
    return jax.nn.log_softmax(p_t, axis=-1)


if __name__ == "__main__":
    # Small shapes consistent with the module's forward.
    seq_length = 8
    input_dim = 8
    hidden_dim = 32
    num_classes = 10
    batch_size = 2

    key = jax.random.PRNGKey(0)
    k_param, k_x = jax.random.split(key)
    params = init_params(k_param, input_dim=input_dim, hidden_dim=hidden_dim,
                         num_classes=num_classes)

    # input tokens in {0, 1, 2} (fed into nn.Embedding(3, input_dim))
    x = jax.random.randint(k_x, (batch_size, seq_length, 1), 0, 3, dtype=jnp.int32)

    fwd = functools.partial(
        peep_lstm_forward,
        seq_length=seq_length, input_dim=input_dim, hidden_dim=hidden_dim,
        num_classes=num_classes, batch_size=batch_size)

    out = jax.block_until_ready(fwd(x, params))

    ref = peep_lstm_reference(x, params, seq_length=seq_length,
                              hidden_dim=hidden_dim, batch_size=batch_size)
    assert out.shape == (batch_size, num_classes)
    assert jnp.allclose(out, ref, atol=1e-4, rtol=1e-4), (out, ref)

    print("KERNEL_OK")
</pallas_src>

<mosaic_0001>
module attributes {stable_mosaic.version = 11 : i64} {
  func.func @_peep_lstm_kernel(%arg0: i32, %arg1: memref<8x8x1xi32, #tpu.memory_space<vmem>>, %arg2: memref<3x128xf32, #tpu.memory_space<vmem>>, %arg3: memref<32x128xf32, #tpu.memory_space<vmem>>, %arg4: memref<32x128xf32, #tpu.memory_space<vmem>>, %arg5: memref<1x128xf32, #tpu.memory_space<vmem>>, %arg6: memref<8x128xf32, #tpu.memory_space<vmem>>) attributes {dimension_semantics = [#tpu.dimension_semantics<parallel>], iteration_bounds = array<i64: 1>, scalar_prefetch = 0 : i64, scratch_operands = 0 : i64, tpu.core_type = #tpu.core_type<tc>, window_params = [{transform_indices = @transform_0, window_bounds = array<i64: 8, 8, 1>}, {pipeline_mode = #tpu.pipeline_mode<synchronous>, transform_indices = @transform_1, window_bounds = array<i64: 3, 128>}, {pipeline_mode = #tpu.pipeline_mode<synchronous>, transform_indices = @transform_2, window_bounds = array<i64: 32, 128>}, {pipeline_mode = #tpu.pipeline_mode<synchronous>, transform_indices = @transform_3, window_bounds = array<i64: 32, 128>}, {pipeline_mode = #tpu.pipeline_mode<synchronous>, transform_indices = @transform_4, window_bounds = array<i64: 1, 128>}, {transform_indices = @transform_5, window_bounds = array<i64: 8, 128>}]} {
    %c0 = arith.constant 0 : index
    %c0_0 = arith.constant 0 : index
    %0 = vector.load %arg3[%c0, %c0_0] : memref<32x128xf32, #tpu.memory_space<vmem>>, vector<32x128xf32>
    %c0_1 = arith.constant 0 : index
    %c0_2 = arith.constant 0 : index
    %1 = vector.load %arg2[%c0_1, %c0_2] : memref<3x128xf32, #tpu.memory_space<vmem>>, vector<1x128xf32>
    %c1 = arith.constant 1 : index
    %c0_3 = arith.constant 0 : index
    %2 = vector.load %arg2[%c1, %c0_3] : memref<3x128xf32, #tpu.memory_space<vmem>>, vector<1x128xf32>
    %c2 = arith.constant 2 : index
    %c0_4 = arith.constant 0 : index
    %3 = vector.load %arg2[%c2, %c0_4] : memref<3x128xf32, #tpu.memory_space<vmem>>, vector<1x128xf32>
    %cst = arith.constant 0.000000e+00 : f32
    %4 = vector.broadcast %cst : f32 to vector<8x32xf32>
    %c0_i32 = arith.constant 0 : i32
    %5 = arith.index_cast %c0_i32 : i32 to index
    %c0_5 = arith.constant 0 : index
    %c0_6 = arith.constant 0 : index
    %6 = vector.load %arg1[%5, %c0_5, %c0_6] : memref<8x8x1xi32, #tpu.memory_space<vmem>>, vector<1x8x1xi32>
    %7 = vector.shape_cast %6 : vector<1x8x1xi32> to vector<8x1xi32>
    %c0_i32_7 = arith.constant 0 : i32
    %8 = vector.broadcast %c0_i32_7 : i32 to vector<8x1xi32>
    %9 = arith.cmpi eq, %7, %8 : vector<8x1xi32>
    %c1_i32 = arith.constant 1 : i32
    %10 = vector.broadcast %c1_i32 : i32 to vector<8x1xi32>
    %11 = arith.cmpi eq, %7, %10 : vector<8x1xi32>
    %12 = vector.shape_cast %11 : vector<8x1xi1> to vector<8x1xi1>
    %13 = vector.broadcast %12 : vector<8x1xi1> to vector<8x128xi1>
    %14 = vector.shape_cast %2 : vector<1x128xf32> to vector<1x128xf32>
    %15 = vector.broadcast %14 : vector<1x128xf32> to vector<8x128xf32>
    %16 = vector.shape_cast %3 : vector<1x128xf32> to vector<1x128xf32>
    %17 = vector.broadcast %16 : vector<1x128xf32> to vector<8x128xf32>
    %18 = arith.select %13, %15, %17 : vector<8x128xi1>, vector<8x128xf32>
    %19 = vector.shape_cast %9 : vector<8x1xi1> to vector<8x1xi1>
    %20 = vector.broadcast %19 : vector<8x1xi1> to vector<8x128xi1>
    %21 = vector.shape_cast %1 : vector<1x128xf32> to vector<1x128xf32>
    %22 = vector.broadcast %21 : vector<1x128xf32> to vector<8x128xf32>
    %23 = arith.select %20, %22, %18 : vector<8x128xi1>, vector<8x128xf32>
    %cst_8 = arith.constant dense<0.000000e+00> : vector<8x128xf32>
    %24 = tpu.matmul %4, %0, %cst_8 {dimension_numbers = #tpu.dot_dimension_numbers<[1], [0], [0], [1], [0, 0, 1, 1], [], []>} : vector<8x32xf32>, vector<32x128xf32>, vector<8x128xf32> -> vector<8x128xf32>
    %25 = arith.addf %23, %24 : vector<8x128xf32>
    %26 = arith.negf %25 : vector<8x128xf32>
    %27 = math.exp %26 : vector<8x128xf32>
    %cst_9 = arith.constant 1.000000e+00 : f32
    %28 = vector.broadcast %cst_9 : f32 to vector<8x128xf32>
    %29 = arith.addf %28, %27 : vector<8x128xf32>
    %30 = arith.divf %28, %29 : vector<8x128xf32>
    %31 = vector.extract_strided_slice %30 {offsets = [0, 0], sizes = [8, 32], strides = [1, 1]} : vector<8x128xf32> to vector<8x32xf32>
    %32 = vector.extract_strided_slice %30 {offsets = [0, 32], sizes = [8, 32], strides = [1, 1]} : vector<8x128xf32> to vector<8x32xf32>
    %33 = vector.extract_strided_slice %30 {offsets = [0, 64], sizes = [8, 32], strides = [1, 1]} : vector<8x128xf32> to vector<8x32xf32>
    %34 = vector.extract_strided_slice %30 {offsets = [0, 96], sizes = [8, 32], strides = [1, 1]} : vector<8x128xf32> to vector<8x32xf32>
    %35 = arith.mulf %34, %31 : vector<8x32xf32>
    %36 = arith.mulf %4, %32 : vector<8x32xf32>
    %37 = arith.addf %35, %36 : vector<8x32xf32>
    %38 = math.tanh %37 : vector<8x32xf32>
    %39 = arith.mulf %38, %33 : vector<8x32xf32>
    %c1_i32_10 = arith.constant 1 : i32
    %40 = arith.index_cast %c1_i32_10 : i32 to index
    %c0_11 = arith.constant 0 : index
    %c0_12 = arith.constant 0 : index
    %41 = vector.load %arg1[%40, %c0_11, %c0_12] : memref<8x8x1xi32, #tpu.memory_space<vmem>>, vector<1x8x1xi32>
    %42 = vector.shape_cast %41 : vector<1x8x1xi32> to vector<8x1xi32>
    %c0_i32_13 = arith.constant 0 : i32
    %43 = vector.broadcast %c0_i32_13 : i32 to vector<8x1xi32>
    %44 = arith.cmpi eq, %42, %43 : vector<8x1xi32>
    %c1_i32_14 = arith.constant 1 : i32
    %45 = vector.broadcast %c1_i32_14 : i32 to vector<8x1xi32>
    %46 = arith.cmpi eq, %42, %45 : vector<8x1xi32>
    %47 = vector.shape_cast %46 : vector<8x1xi1> to vector<8x1xi1>
    %48 = vector.broadcast %47 : vector<8x1xi1> to vector<8x128xi1>
    %49 = vector.shape_cast %2 : vector<1x128xf32> to vector<1x128xf32>
    %50 = vector.broadcast %49 : vector<1x128xf32> to vector<8x128xf32>
    %51 = vector.shape_cast %3 : vector<1x128xf32> to vector<1x128xf32>
    %52 = vector.broadcast %51 : vector<1x128xf32> to vector<8x128xf32>
    %53 = arith.select %48, %50, %52 : vector<8x128xi1>, vector<8x128xf32>
    %54 = vector.shape_cast %44 : vector<8x1xi1> to vector<8x1xi1>
    %55 = vector.broadcast %54 : vector<8x1xi1> to vector<8x128xi1>
    %56 = vector.shape_cast %1 : vector<1x128xf32> to vector<1x128xf32>
    %57 = vector.broadcast %56 : vector<1x128xf32> to vector<8x128xf32>
    %58 = arith.select %55, %57, %53 : vector<8x128xi1>, vector<8x128xf32>
    %cst_15 = arith.constant dense<0.000000e+00> : vector<8x128xf32>
    %59 = tpu.matmul %37, %0, %cst_15 {dimension_numbers = #tpu.dot_dimension_numbers<[1], [0], [0], [1], [0, 0, 1, 1], [], []>} : vector<8x32xf32>, vector<32x128xf32>, vector<8x128xf32> -> vector<8x128xf32>
    %60 = arith.addf %58, %59 : vector<8x128xf32>
    %61 = arith.negf %60 : vector<8x128xf32>
    %62 = math.exp %61 : vector<8x128xf32>
    %cst_16 = arith.constant 1.000000e+00 : f32
    %63 = vector.broadcast %cst_16 : f32 to vector<8x128xf32>
    %64 = arith.addf %63, %62 : vector<8x128xf32>
    %65 = arith.divf %63, %64 : vector<8x128xf32>
    %66 = vector.extract_strided_slice %65 {offsets = [0, 0], sizes = [8, 32], strides = [1, 1]} : vector<8x128xf32> to vector<8x32xf32>
    %67 = vector.extract_strided_slice %65 {offsets = [0, 32], sizes = [8, 32], strides = [1, 1]} : vector<8x128xf32> to vector<8x32xf32>
    %68 = vector.extract_strided_slice %65 {offsets = [0, 64], sizes = [8, 32], strides = [1, 1]} : vector<8x128xf32> to vector<8x32xf32>
    %69 = vector.extract_strided_slice %65 {offsets = [0, 96], sizes = [8, 32], strides = [1, 1]} : vector<8x128xf32> to vector<8x32xf32>
    %70 = arith.mulf %69, %66 : vector<8x32xf32>
    %71 = arith.mulf %37, %67 : vector<8x32xf32>
    %72 = arith.addf %70, %71 : vector<8x32xf32>
    %73 = math.tanh %72 : vector<8x32xf32>
    %74 = arith.mulf %73, %68 : vector<8x32xf32>
    %c2_i32 = arith.constant 2 : i32
    %75 = arith.index_cast %c2_i32 : i32 to index
    %c0_17 = arith.constant 0 : index
    %c0_18 = arith.constant 0 : index
    %76 = vector.load %arg1[%75, %c0_17, %c0_18] : memref<8x8x1xi32, #tpu.memory_space<vmem>>, vector<1x8x1xi32>
    %77 = vector.shape_cast %76 : vector<1x8x1xi32> to vector<8x1xi32>
    %c0_i32_19 = arith.constant 0 : i32
    %78 = vector.broadcast %c0_i32_19 : i32 to vector<8x1xi32>
    %79 = arith.cmpi eq, %77, %78 : vector<8x1xi32>
    %c1_i32_20 = arith.constant 1 : i32
    %80 = vector.broadcast %c1_i32_20 : i32 to vector<8x1xi32>
    %81 = arith.cmpi eq, %77, %80 : vector<8x1xi32>
    %82 = vector.shape_cast %81 : vector<8x1xi1> to vector<8x1xi1>
    %83 = vector.broadcast %82 : vector<8x1xi1> to vector<8x128xi1>
    %84 = vector.shape_cast %2 : vector<1x128xf32> to vector<1x128xf32>
    %85 = vector.broadcast %84 : vector<1x128xf32> to vector<8x128xf32>
    %86 = vector.shape_cast %3 : vector<1x128xf32> to vector<1x128xf32>
    %87 = vector.broadcast %86 : vector<1x128xf32> to vector<8x128xf32>
    %88 = arith.select %83, %85, %87 : vector<8x128xi1>, vector<8x128xf32>
    %89 = vector.shape_cast %79 : vector<8x1xi1> to vector<8x1xi1>
    %90 = vector.broadcast %89 : vector<8x1xi1> to vector<8x128xi1>
    %91 = vector.shape_cast %1 : vector<1x128xf32> to vector<1x128xf32>
    %92 = vector.broadcast %91 : vector<1x128xf32> to vector<8x128xf32>
    %93 = arith.select %90, %92, %88 : vector<8x128xi1>, vector<8x128xf32>
    %cst_21 = arith.constant dense<0.000000e+00> : vector<8x128xf32>
    %94 = tpu.matmul %72, %0, %cst_21 {dimension_numbers = #tpu.dot_dimension_numbers<[1], [0], [0], [1], [0, 0, 1, 1], [], []>} : vector<8x32xf32>, vector<32x128xf32>, vector<8x128xf32> -> vector<8x128xf32>
    %95 = arith.addf %93, %94 : vector<8x128xf32>
    %96 = arith.negf %95 : vector<8x128xf32>
    %97 = math.exp %96 : vector<8x128xf32>
    %cst_22 = arith.constant 1.000000e+00 : f32
    %98 = vector.broadcast %cst_22 : f32 to vector<8x128xf32>
    %99 = arith.addf %98, %97 : vector<8x128xf32>
    %100 = arith.divf %98, %99 : vector<8x128xf32>
    %101 = vector.extract_strided_slice %100 {offsets = [0, 0], sizes = [8, 32], strides = [1, 1]} : vector<8x128xf32> to vector<8x32xf32>
    %102 = vector.extract_strided_slice %100 {offsets = [0, 32], sizes = [8, 32], strides = [1, 1]} : vector<8x128xf32> to vector<8x32xf32>
    %103 = vector.extract_strided_slice %100 {offsets = [0, 64], sizes = [8, 32], strides = [1, 1]} : vector<8x128xf32> to vector<8x32xf32>
    %104 = vector.extract_strided_slice %100 {offsets = [0, 96], sizes = [8, 32], strides = [1, 1]} : vector<8x128xf32> to vector<8x32xf32>
    %105 = arith.mulf %104, %101 : vector<8x32xf32>
    %106 = arith.mulf %72, %102 : vector<8x32xf32>
    %107 = arith.addf %105, %106 : vector<8x32xf32>
    %108 = math.tanh %107 : vector<8x32xf32>
    %109 = arith.mulf %108, %103 : vector<8x32xf32>
    %c3_i32 = arith.constant 3 : i32
    %110 = arith.index_cast %c3_i32 : i32 to index
    %c0_23 = arith.constant 0 : index
    %c0_24 = arith.constant 0 : index
    %111 = vector.load %arg1[%110, %c0_23, %c0_24] : memref<8x8x1xi32, #tpu.memory_space<vmem>>, vector<1x8x1xi32>
    %112 = vector.shape_cast %111 : vector<1x8x1xi32> to vector<8x1xi32>
    %c0_i32_25 = arith.constant 0 : i32
    %113 = vector.broadcast %c0_i32_25 : i32 to vector<8x1xi32>
    %114 = arith.cmpi eq, %112, %113 : vector<8x1xi32>
    %c1_i32_26 = arith.constant 1 : i32
    %115 = vector.broadcast %c1_i32_26 : i32 to vector<8x1xi32>
    %116 = arith.cmpi eq, %112, %115 : vector<8x1xi32>
    %117 = vector.shape_cast %116 : vector<8x1xi1> to vector<8x1xi1>
    %118 = vector.broadcast %117 : vector<8x1xi1> to vector<8x128xi1>
    %119 = vector.shape_cast %2 : vector<1x128xf32> to vector<1x128xf32>
    %120 = vector.broadcast %119 : vector<1x128xf32> to vector<8x128xf32>
    %121 = vector.shape_cast %3 : vector<1x128xf32> to vector<1x128xf32>
    %122 = vector.broadcast %121 : vector<1x128xf32> to vector<8x128xf32>
    %123 = arith.select %118, %120, %122 : vector<8x128xi1>, vector<8x128xf32>
    %124 = vector.shape_cast %114 : vector<8x1xi1> to vector<8x1xi1>
    %125 = vector.broadcast %124 : vector<8x1xi1> to vector<8x128xi1>
    %126 = vector.shape_cast %1 : vector<1x128xf32> to vector<1x128xf32>
    %127 = vector.broadcast %126 : vector<1x128xf32> to vector<8x128xf32>
    %128 = arith.select %125, %127, %123 : vector<8x128xi1>, vector<8x128xf32>
    %cst_27 = arith.constant dense<0.000000e+00> : vector<8x128xf32>
    %129 = tpu.matmul %107, %0, %cst_27 {dimension_numbers = #tpu.dot_dimension_numbers<[1], [0], [0], [1], [0, 0, 1, 1], [], []>} : vector<8x32xf32>, vector<32x128xf32>, vector<8x128xf32> -> vector<8x128xf32>
    %130 = arith.addf %128, %129 : vector<8x128xf32>
    %131 = arith.negf %130 : vector<8x128xf32>
    %132 = math.exp %131 : vector<8x128xf32>
    %cst_28 = arith.constant 1.000000e+00 : f32
    %133 = vector.broadcast %cst_28 : f32 to vector<8x128xf32>
    %134 = arith.addf %133, %132 : vector<8x128xf32>
    %135 = arith.divf %133, %134 : vector<8x128xf32>
    %136 = vector.extract_strided_slice %135 {offsets = [0, 0], sizes = [8, 32], strides = [1, 1]} : vector<8x128xf32> to vector<8x32xf32>
    %137 = vector.extract_strided_slice %135 {offsets = [0, 32], sizes = [8, 32], strides = [1, 1]} : vector<8x128xf32> to vector<8x32xf32>
    %138 = vector.extract_strided_slice %135 {offsets = [0, 64], sizes = [8, 32], strides = [1, 1]} : vector<8x128xf32> to vector<8x32xf32>
    %139 = vector.extract_strided_slice %135 {offsets = [0, 96], sizes = [8, 32], strides = [1, 1]} : vector<8x128xf32> to vector<8x32xf32>
    %140 = arith.mulf %139, %136 : vector<8x32xf32>
    %141 = arith.mulf %107, %137 : vector<8x32xf32>
    %142 = arith.addf %140, %141 : vector<8x32xf32>
    %143 = math.tanh %142 : vector<8x32xf32>
    %144 = arith.mulf %143, %138 : vector<8x32xf32>
    %c4_i32 = arith.constant 4 : i32
    %145 = arith.index_cast %c4_i32 : i32 to index
    %c0_29 = arith.constant 0 : index
    %c0_30 = arith.constant 0 : index
    %146 = vector.load %arg1[%145, %c0_29, %c0_30] : memref<8x8x1xi32, #tpu.memory_space<vmem>>, vector<1x8x1xi32>
    %147 = vector.shape_cast %146 : vector<1x8x1xi32> to vector<8x1xi32>
    %c0_i32_31 = arith.constant 0 : i32
    %148 = vector.broadcast %c0_i32_31 : i32 to vector<8x1xi32>
    %149 = arith.cmpi eq, %147, %148 : vector<8x1xi32>
    %c1_i32_32 = arith.constant 1 : i32
    %150 = vector.broadcast %c1_i32_32 : i32 to vector<8x1xi32>
    %151 = arith.cmpi eq, %147, %150 : vector<8x1xi32>
    %152 = vector.shape_cast %151 : vector<8x1xi1> to vector<8x1xi1>
    %153 = vector.broadcast %152 : vector<8x1xi1> to vector<8x128xi1>
    %154 = vector.shape_cast %2 : vector<1x128xf32> to vector<1x128xf32>
    %155 = vector.broadcast %154 : vector<1x128xf32> to vector<8x128xf32>
    %156 = vector.shape_cast %3 : vector<1x128xf32> to vector<1x128xf32>
    %157 = vector.broadcast %156 : vector<1x128xf32> to vector<8x128xf32>
    %158 = arith.select %153, %155, %157 : vector<8x128xi1>, vector<8x128xf32>
    %159 = vector.shape_cast %149 : vector<8x1xi1> to vector<8x1xi1>
    %160 = vector.broadcast %159 : vector<8x1xi1> to vector<8x128xi1>
    %161 = vector.shape_cast %1 : vector<1x128xf32> to vector<1x128xf32>
    %162 = vector.broadcast %161 : vector<1x128xf32> to vector<8x128xf32>
    %163 = arith.select %160, %162, %158 : vector<8x128xi1>, vector<8x128xf32>
    %cst_33 = arith.constant dense<0.000000e+00> : vector<8x128xf32>
    %164 = tpu.matmul %142, %0, %cst_33 {dimension_numbers = #tpu.dot_dimension_numbers<[1], [0], [0], [1], [0, 0, 1, 1], [], []>} : vector<8x32xf32>, vector<32x128xf32>, vector<8x128xf32> -> vector<8x128xf32>
    %165 = arith.addf %163, %164 : vector<8x128xf32>
    %166 = arith.negf %165 : vector<8x128xf32>
    %167 = math.exp %166 : vector<8x128xf32>
    %cst_34 = arith.constant 1.000000e+00 : f32
    %168 = vector.broadcast %cst_34 : f32 to vector<8x128xf32>
    %169 = arith.addf %168, %167 : vector<8x128xf32>
    %170 = arith.divf %168, %169 : vector<8x128xf32>
    %171 = vector.extract_strided_slice %170 {offsets = [0, 0], sizes = [8, 32], strides = [1, 1]} : vector<8x128xf32> to vector<8x32xf32>
    %172 = vector.extract_strided_slice %170 {offsets = [0, 32], sizes = [8, 32], strides = [1, 1]} : vector<8x128xf32> to vector<8x32xf32>
    %173 = vector.extract_strided_slice %170 {offsets = [0, 64], sizes = [8, 32], strides = [1, 1]} : vector<8x128xf32> to vector<8x32xf32>
    %174 = vector.extract_strided_slice %170 {offsets = [0, 96], sizes = [8, 32], strides = [1, 1]} : vector<8x128xf32> to vector<8x32xf32>
    %175 = arith.mulf %174, %171 : vector<8x32xf32>
    %176 = arith.mulf %142, %172 : vector<8x32xf32>
    %177 = arith.addf %175, %176 : vector<8x32xf32>
    %178 = math.tanh %177 : vector<8x32xf32>
    %179 = arith.mulf %178, %173 : vector<8x32xf32>
    %c5_i32 = arith.constant 5 : i32
    %180 = arith.index_cast %c5_i32 : i32 to index
    %c0_35 = arith.constant 0 : index
    %c0_36 = arith.constant 0 : index
    %181 = vector.load %arg1[%180, %c0_35, %c0_36] : memref<8x8x1xi32, #tpu.memory_space<vmem>>, vector<1x8x1xi32>
    %182 = vector.shape_cast %181 : vector<1x8x1xi32> to vector<8x1xi32>
    %c0_i32_37 = arith.constant 0 : i32
    %183 = vector.broadcast %c0_i32_37 : i32 to vector<8x1xi32>
    %184 = arith.cmpi eq, %182, %183 : vector<8x1xi32>
    %c1_i32_38 = arith.constant 1 : i32
    %185 = vector.broadcast %c1_i32_38 : i32 to vector<8x1xi32>
    %186 = arith.cmpi eq, %182, %185 : vector<8x1xi32>
    %187 = vector.shape_cast %186 : vector<8x1xi1> to vector<8x1xi1>
    %188 = vector.broadcast %187 : vector<8x1xi1> to vector<8x128xi1>
    %189 = vector.shape_cast %2 : vector<1x128xf32> to vector<1x128xf32>
    %190 = vector.broadcast %189 : vector<1x128xf32> to vector<8x128xf32>
    %191 = vector.shape_cast %3 : vector<1x128xf32> to vector<1x128xf32>
    %192 = vector.broadcast %191 : vector<1x128xf32> to vector<8x128xf32>
    %193 = arith.select %188, %190, %192 : vector<8x128xi1>, vector<8x128xf32>
    %194 = vector.shape_cast %184 : vector<8x1xi1> to vector<8x1xi1>
    %195 = vector.broadcast %194 : vector<8x1xi1> to vector<8x128xi1>
    %196 = vector.shape_cast %1 : vector<1x128xf32> to vector<1x128xf32>
    %197 = vector.broadcast %196 : vector<1x128xf32> to vector<8x128xf32>
    %198 = arith.select %195, %197, %193 : vector<8x128xi1>, vector<8x128xf32>
    %cst_39 = arith.constant dense<0.000000e+00> : vector<8x128xf32>
    %199 = tpu.matmul %177, %0, %cst_39 {dimension_numbers = #tpu.dot_dimension_numbers<[1], [0], [0], [1], [0, 0, 1, 1], [], []>} : vector<8x32xf32>, vector<32x128xf32>, vector<8x128xf32> -> vector<8x128xf32>
    %200 = arith.addf %198, %199 : vector<8x128xf32>
    %201 = arith.negf %200 : vector<8x128xf32>
    %202 = math.exp %201 : vector<8x128xf32>
    %cst_40 = arith.constant 1.000000e+00 : f32
    %203 = vector.broadcast %cst_40 : f32 to vector<8x128xf32>
    %204 = arith.addf %203, %202 : vector<8x128xf32>
    %205 = arith.divf %203, %204 : vector<8x128xf32>
    %206 = vector.extract_strided_slice %205 {offsets = [0, 0], sizes = [8, 32], strides = [1, 1]} : vector<8x128xf32> to vector<8x32xf32>
    %207 = vector.extract_strided_slice %205 {offsets = [0, 32], sizes = [8, 32], strides = [1, 1]} : vector<8x128xf32> to vector<8x32xf32>
    %208 = vector.extract_strided_slice %205 {offsets = [0, 64], sizes = [8, 32], strides = [1, 1]} : vector<8x128xf32> to vector<8x32xf32>
    %209 = vector.extract_strided_slice %205 {offsets = [0, 96], sizes = [8, 32], strides = [1, 1]} : vector<8x128xf32> to vector<8x32xf32>
    %210 = arith.mulf %209, %206 : vector<8x32xf32>
    %211 = arith.mulf %177, %207 : vector<8x32xf32>
    %212 = arith.addf %210, %211 : vector<8x32xf32>
    %213 = math.tanh %212 : vector<8x32xf32>
    %214 = arith.mulf %213, %208 : vector<8x32xf32>
    %c6_i32 = arith.constant 6 : i32
    %215 = arith.index_cast %c6_i32 : i32 to index
    %c0_41 = arith.constant 0 : index
    %c0_42 = arith.constant 0 : index
    %216 = vector.load %arg1[%215, %c0_41, %c0_42] : memref<8x8x1xi32, #tpu.memory_space<vmem>>, vector<1x8x1xi32>
    %217 = vector.shape_cast %216 : vector<1x8x1xi32> to vector<8x1xi32>
    %c0_i32_43 = arith.constant 0 : i32
    %218 = vector.broadcast %c0_i32_43 : i32 to vector<8x1xi32>
    %219 = arith.cmpi eq, %217, %218 : vector<8x1xi32>
    %c1_i32_44 = arith.constant 1 : i32
    %220 = vector.broadcast %c1_i32_44 : i32 to vector<8x1xi32>
    %221 = arith.cmpi eq, %217, %220 : vector<8x1xi32>
    %222 = vector.shape_cast %221 : vector<8x1xi1> to vector<8x1xi1>
    %223 = vector.broadcast %222 : vector<8x1xi1> to vector<8x128xi1>
    %224 = vector.shape_cast %2 : vector<1x128xf32> to vector<1x128xf32>
    %225 = vector.broadcast %224 : vector<1x128xf32> to vector<8x128xf32>
    %226 = vector.shape_cast %3 : vector<1x128xf32> to vector<1x128xf32>
    %227 = vector.broadcast %226 : vector<1x128xf32> to vector<8x128xf32>
    %228 = arith.select %223, %225, %227 : vector<8x128xi1>, vector<8x128xf32>
    %229 = vector.shape_cast %219 : vector<8x1xi1> to vector<8x1xi1>
    %230 = vector.broadcast %229 : vector<8x1xi1> to vector<8x128xi1>
    %231 = vector.shape_cast %1 : vector<1x128xf32> to vector<1x128xf32>
    %232 = vector.broadcast %231 : vector<1x128xf32> to vector<8x128xf32>
    %233 = arith.select %230, %232, %228 : vector<8x128xi1>, vector<8x128xf32>
    %cst_45 = arith.constant dense<0.000000e+00> : vector<8x128xf32>
    %234 = tpu.matmul %212, %0, %cst_45 {dimension_numbers = #tpu.dot_dimension_numbers<[1], [0], [0], [1], [0, 0, 1, 1], [], []>} : vector<8x32xf32>, vector<32x128xf32>, vector<8x128xf32> -> vector<8x128xf32>
    %235 = arith.addf %233, %234 : vector<8x128xf32>
    %236 = arith.negf %235 : vector<8x128xf32>
    %237 = math.exp %236 : vector<8x128xf32>
    %cst_46 = arith.constant 1.000000e+00 : f32
    %238 = vector.broadcast %cst_46 : f32 to vector<8x128xf32>
    %239 = arith.addf %238, %237 : vector<8x128xf32>
    %240 = arith.divf %238, %239 : vector<8x128xf32>
    %241 = vector.extract_strided_slice %240 {offsets = [0, 0], sizes = [8, 32], strides = [1, 1]} : vector<8x128xf32> to vector<8x32xf32>
    %242 = vector.extract_strided_slice %240 {offsets = [0, 32], sizes = [8, 32], strides = [1, 1]} : vector<8x128xf32> to vector<8x32xf32>
    %243 = vector.extract_strided_slice %240 {offsets = [0, 64], sizes = [8, 32], strides = [1, 1]} : vector<8x128xf32> to vector<8x32xf32>
    %244 = vector.extract_strided_slice %240 {offsets = [0, 96], sizes = [8, 32], strides = [1, 1]} : vector<8x128xf32> to vector<8x32xf32>
    %245 = arith.mulf %244, %241 : vector<8x32xf32>
    %246 = arith.mulf %212, %242 : vector<8x32xf32>
    %247 = arith.addf %245, %246 : vector<8x32xf32>
    %248 = math.tanh %247 : vector<8x32xf32>
    %249 = arith.mulf %248, %243 : vector<8x32xf32>
    %c7_i32 = arith.constant 7 : i32
    %250 = arith.index_cast %c7_i32 : i32 to index
    %c0_47 = arith.constant 0 : index
    %c0_48 = arith.constant 0 : index
    %251 = vector.load %arg1[%250, %c0_47, %c0_48] : memref<8x8x1xi32, #tpu.memory_space<vmem>>, vector<1x8x1xi32>
    %252 = vector.shape_cast %251 : vector<1x8x1xi32> to vector<8x1xi32>
    %c0_i32_49 = arith.constant 0 : i32
    %253 = vector.broadcast %c0_i32_49 : i32 to vector<8x1xi32>
    %254 = arith.cmpi eq, %252, %253 : vector<8x1xi32>
    %c1_i32_50 = arith.constant 1 : i32
    %255 = vector.broadcast %c1_i32_50 : i32 to vector<8x1xi32>
    %256 = arith.cmpi eq, %252, %255 : vector<8x1xi32>
    %257 = vector.shape_cast %256 : vector<8x1xi1> to vector<8x1xi1>
    %258 = vector.broadcast %257 : vector<8x1xi1> to vector<8x128xi1>
    %259 = vector.shape_cast %2 : vector<1x128xf32> to vector<1x128xf32>
    %260 = vector.broadcast %259 : vector<1x128xf32> to vector<8x128xf32>
    %261 = vector.shape_cast %3 : vector<1x128xf32> to vector<1x128xf32>
    %262 = vector.broadcast %261 : vector<1x128xf32> to vector<8x128xf32>
    %263 = arith.select %258, %260, %262 : vector<8x128xi1>, vector<8x128xf32>
    %264 = vector.shape_cast %254 : vector<8x1xi1> to vector<8x1xi1>
    %265 = vector.broadcast %264 : vector<8x1xi1> to vector<8x128xi1>
    %266 = vector.shape_cast %1 : vector<1x128xf32> to vector<1x128xf32>
    %267 = vector.broadcast %266 : vector<1x128xf32> to vector<8x128xf32>
    %268 = arith.select %265, %267, %263 : vector<8x128xi1>, vector<8x128xf32>
    %cst_51 = arith.constant dense<0.000000e+00> : vector<8x128xf32>
    %269 = tpu.matmul %247, %0, %cst_51 {dimension_numbers = #tpu.dot_dimension_numbers<[1], [0], [0], [1], [0, 0, 1, 1], [], []>} : vector<8x32xf32>, vector<32x128xf32>, vector<8x128xf32> -> vector<8x128xf32>
    %270 = arith.addf %268, %269 : vector<8x128xf32>
    %271 = arith.negf %270 : vector<8x128xf32>
    %272 = math.exp %271 : vector<8x128xf32>
    %cst_52 = arith.constant 1.000000e+00 : f32
    %273 = vector.broadcast %cst_52 : f32 to vector<8x128xf32>
    %274 = arith.addf %273, %272 : vector<8x128xf32>
    %275 = arith.divf %273, %274 : vector<8x128xf32>
    %276 = vector.extract_strided_slice %275 {offsets = [0, 0], sizes = [8, 32], strides = [1, 1]} : vector<8x128xf32> to vector<8x32xf32>
    %277 = vector.extract_strided_slice %275 {offsets = [0, 32], sizes = [8, 32], strides = [1, 1]} : vector<8x128xf32> to vector<8x32xf32>
    %278 = vector.extract_strided_slice %275 {offsets = [0, 64], sizes = [8, 32], strides = [1, 1]} : vector<8x128xf32> to vector<8x32xf32>
    %279 = vector.extract_strided_slice %275 {offsets = [0, 96], sizes = [8, 32], strides = [1, 1]} : vector<8x128xf32> to vector<8x32xf32>
    %280 = arith.mulf %279, %276 : vector<8x32xf32>
    %281 = arith.mulf %247, %277 : vector<8x32xf32>
    %282 = arith.addf %280, %281 : vector<8x32xf32>
    %283 = math.tanh %282 : vector<8x32xf32>
    %284 = arith.mulf %283, %278 : vector<8x32xf32>
    %c8_i32 = arith.constant 8 : i32
    %c0_53 = arith.constant 0 : index
    %c0_54 = arith.constant 0 : index
    %285 = vector.load %arg4[%c0_53, %c0_54] : memref<32x128xf32, #tpu.memory_space<vmem>>, vector<32x128xf32>
    %cst_55 = arith.constant dense<0.000000e+00> : vector<8x128xf32>
    %286 = tpu.matmul %284, %285, %cst_55 {dimension_numbers = #tpu.dot_dimension_numbers<[1], [0], [0], [1], [0, 0, 1, 1], [], []>} : vector<8x32xf32>, vector<32x128xf32>, vector<8x128xf32> -> vector<8x128xf32>
    %c0_56 = arith.constant 0 : index
    %c0_57 = arith.constant 0 : index
    %287 = vector.load %arg5[%c0_56, %c0_57] : memref<1x128xf32, #tpu.memory_space<vmem>>, vector<1x128xf32>
    %288 = vector.broadcast %287 : vector<1x128xf32> to vector<8x128xf32>
    %289 = arith.addf %286, %288 : vector<8x128xf32>
    %cst_58 = arith.constant dense<0xFF800000> : vector<8xf32>
    %290 = vector.multi_reduction <maximumf>, %289, %cst_58 [1] : vector<8x128xf32> to vector<8xf32>
    %291 = vector.shape_cast %290 : vector<8xf32> to vector<8x1xf32>
    %292 = vector.broadcast %291 : vector<8x1xf32> to vector<8x128xf32>
    %293 = arith.subf %289, %292 : vector<8x128xf32>
    %294 = math.exp %293 : vector<8x128xf32>
    %cst_59 = arith.constant dense<0.000000e+00> : vector<8xf32>
    %295 = vector.multi_reduction <add>, %294, %cst_59 [1] : vector<8x128xf32> to vector<8xf32>
    %296 = vector.shape_cast %295 : vector<8xf32> to vector<8x1xf32>
    %297 = math.log %296 : vector<8x1xf32>
    %298 = vector.broadcast %297 : vector<8x1xf32> to vector<8x128xf32>
    %299 = arith.subf %293, %298 : vector<8x128xf32>
    %c0_60 = arith.constant 0 : index
    %c0_61 = arith.constant 0 : index
    %300 = vector.load %arg6[%c0_60, %c0_61] : memref<8x128xf32, #tpu.memory_space<vmem>>, vector<8x128xf32>
    tpu.vector_store %arg6[%c0_60, %c0_61], %299 {strides = array<i32>} : memref<8x128xf32, #tpu.memory_space<vmem>>, vector<8x128xf32>,
    return
  }
  func.func @transform_0(%arg0: i32) -> (i32, i32, i32) {
    %c0_i32 = arith.constant 0 : i32
    %c0_i32_0 = arith.constant 0 : i32
    %c0_i32_1 = arith.constant 0 : i32
    return %c0_i32, %arg0, %c0_i32_0 : i32, i32, i32
  }
  func.func @transform_1(%arg0: i32) -> (i32, i32) {
    %c0_i32 = arith.constant 0 : i32
    %c0_i32_0 = arith.constant 0 : i32
    %c0_i32_1 = arith.constant 0 : i32
    return %c0_i32, %c0_i32_0 : i32, i32
  }
  func.func @transform_2(%arg0: i32) -> (i32, i32) {
    %c0_i32 = arith.constant 0 : i32
    %c0_i32_0 = arith.constant 0 : i32
    %c0_i32_1 = arith.constant 0 : i32
    return %c0_i32, %c0_i32_0 : i32, i32
  }
  func.func @transform_3(%arg0: i32) -> (i32, i32) {
    %c0_i32 = arith.constant 0 : i32
    %c0_i32_0 = arith.constant 0 : i32
    %c0_i32_1 = arith.constant 0 : i32
    return %c0_i32, %c0_i32_0 : i32, i32
  }
  func.func @transform_4(%arg0: i32) -> (i32, i32) {
    %c0_i32 = arith.constant 0 : i32
    %c0_i32_0 = arith.constant 0 : i32
    %c0_i32_1 = arith.constant 0 : i32
    return %c0_i32, %c0_i32_0 : i32, i32
  }
  func.func @transform_5(%arg0: i32) -> (i32, i32) {
    %c0_i32 = arith.constant 0 : i32
    %c0_i32_0 = arith.constant 0 : i32
    return %arg0, %c0_i32 : i32, i32
  }
}

</mosaic_0001>

<bundles_post_ra>
// kernel: tpu_custom_call.1
= control target key start
LH: loop header
LB: loop body
LE: loop exit
PB: predicated region body
PF: predicated region fallthrough
CT: control target
= control target key end

     0   :  { %v763_v3 = vmov 0   ;;  %s948_s0 = inlined_call_operand.vmem [shape: s32[8,8,1], index: 0, kind: input, shape index: {}]   ;;  %s949_s1 = inlined_call_operand.vmem [shape: f32[3,128], index: 1, kind: input, shape index: {}]   ;;  %s950_s2 = inlined_call_operand.vmem [shape: f32[32,128], index: 2, kind: input, shape index: {}]   ;;  %s951_s3 = inlined_call_operand.vmem [shape: f32[32,128], index: 3, kind: input, shape index: {}]   ;;  %s952_s4 = inlined_call_operand.vmem [shape: f32[1,128], index: 4, kind: input, shape index: {}]   ;;  %s953_s5 = inlined_call_operand.hbm [shape: f32[8,128], index: 5, kind: output, shape index: {}]  }
   0x1   :  { %v24_v0 = vld [vmem:[%s950_s2 + $0x18] sm:$0xff]  ;;  %v28_v1 = vld [vmem:[%s948_s0] sm:$0xff]  ;;  %v23_v2 = vld [vmem:[%s950_s2 + $0x10] sm:$0xff]  ;;  %692 = vset.pattern.permute.xlu0 %v763_v3  ;;  %693 = vset.pattern.permute.xlu2 %v763_v3 }
   0x2   :  { %62 = vmatpush.msra.mxu0 %v24_v0  ;;  %vm30_vm0 = vcmp.eq.s32.totalorder %v28_v1, 1  ;;  %v22_v5 = vld [vmem:[%s950_s2 + $0x8] sm:$0xff]  ;;  %134 = vmatpush.msra.mxu1 %v24_v0  ;;  %v21_v6 = vld [vmem:[%s950_s2] sm:$0xff] }
   0x3   :  { %v31_v4 = vsel %vm30_vm0, 1, %v763_v3  ;;  %694 = vset.pattern.permute.xlu1 %v763_v3 }
   0x4   :  { %33 = vperm.xlu0 %692, %v31_v4   ;;  %63 = vmatpush.msra.mxu0 %v23_v2 }
   0x5   :  { %135 = vmatpush.msra.mxu1 %v23_v2 }
   0x6   :  { %10 = vsyncpa [#allocation3], 0  ;;  %64 = vmatpush.msra.mxu0 %v22_v5  ;;  %vm29_vm1 = vcmp.eq.s32.totalorder %v28_v1, 0  ;;  %205 = vmatpush.msra.mxu2 %v24_v0  ;;  %v764_v7 = vmov 0.0   ;;  %v822_v9 = vld [vmem:[%s948_s0 + $0x8] sm:$0xff]  ;;  %s766_s10 = smov 64  }
   0x7   :  { %136 = vmatpush.msra.mxu1 %v22_v5  ;;  %276 = vmatpush.msra.mxu3 %v24_v0  ;;  %v39_v8 = vsel %vm29_vm1, 1, %v763_v3  ;;  %vm103_vm2 = vcmp.eq.s32.totalorder %v822_v9, 0  ;;  %v829_v12 = vld [vmem:[%s949_s1 + $0x1] ss:$0 sm:$0xff]  ;;  %v834_v13 = vld [vmem:[%s949_s1 + $0x2] ss:$0 sm:$0xff] }
   0x8   :  { %65 = vmatpush.msra.mxu0 %v21_v6  ;;  %206 = vmatpush.msra.mxu2 %v23_v2  ;;  %v111_v10 = vsel %vm103_vm2, 1, %v763_v3  ;;  %v839_v15 = vld [vmem:[%s949_s1] ss:$0 sm:$0xff]  ;;  %s765_s1 = smov 96   ;;  %s767_s11 = smov 32   ;;  %vm104_vm9 = vcmp.eq.s32.totalorder %v822_v9, 1 }
   0x9   :  { %66 = vmatmul.f32.vlgmr.msra.gmra.mxu0 %v764_v7  ;;  %137 = vmatpush.msra.mxu1 %v21_v6  ;;  %v105_v38 = vsel %vm104_vm9, 1, %v763_v3  ;;  %vm46_vm10 = vcmask 261120   ;;  %v667_v59 = vld [vmem:[%s948_s0 + $0x10] sm:$0xff] }
   0xa   :  { %207 = vmatpush.msra.mxu2 %v22_v5  ;;  %277 = vmatpush.msra.mxu3 %v23_v2  ;;  %vm174_vm1 = vcmp.eq.s32.totalorder %v667_v59, 0  ;;  %vm175_vm2 = vcmp.eq.s32.totalorder %v667_v59, 1 }
   0xb   :  { %347 = vmatpush.msrb.mxu0 %v24_v0  ;;  %418 = vmatpush.msrb.mxu1 %v24_v0  ;;  %v182_v60 = vsel %vm174_vm1, 1, %v763_v3  ;;  %v176_v61 = vsel %vm175_vm2, 1, %v763_v3 }
   0xc   :  { %41 = vperm.xlu0 %692, %v39_v8   ;;  %208 = vmatpush.msra.mxu2 %v21_v6 }
   0xd   :  { %278 = vmatpush.msra.mxu3 %v22_v5  ;;  %348 = vmatpush.msrb.mxu0 %v23_v2 }
   0xe   :  { %419 = vmatpush.msrb.mxu1 %v23_v2  ;;  %489 = vmatpush.msrb.mxu2 %v24_v0 }
   0xf   :  { %279 = vmatpush.msra.mxu3 %v21_v6  ;;  %349 = vmatpush.msrb.mxu0 %v22_v5 }
  0x10   :  { %420 = vmatpush.msrb.mxu1 %v22_v5  ;;  %490 = vmatpush.msrb.mxu2 %v23_v2 }
  0x11   :  { %350 = vmatpush.msrb.mxu0 %v21_v6  ;;  %560 = vmatpush.msrb.mxu3 %v24_v0 }
  0x12   :  { %421 = vmatpush.msrb.mxu1 %v21_v6  ;;  %491 = vmatpush.msrb.mxu2 %v22_v5 }
  0x13   :  { %561 = vmatpush.msrb.mxu3 %v23_v2 }
  0x14   :  { %113 = vperm.xlu0 %692, %v111_v10   ;;  %492 = vmatpush.msrb.mxu2 %v21_v6 }
  0x15   :  { %562 = vmatpush.msrb.mxu3 %v22_v5 }
  0x17   :  { %563 = vmatpush.msrb.mxu3 %v21_v6 }
  0x76   :  { %v34_v11 = vpop.permute.xlu0 %33 }
  0x77   :  { %vm35_vm3 = vcmp.eq.s32.totalorder %v34_v11, 1 }
  0x78   :  { %v38_v16 = vsel %vm35_vm3, %v829_v12, %v834_v13 }
  0x7e   :  { %v42_v14 = vpop.permute.xlu0 %41 }
  0x7f   :  { %vm43_vm4 = vcmp.eq.s32.totalorder %v42_v14, 1 }
  0x80   :  { %v45_v17 = vsel %vm43_vm4, %v839_v15, %v38_v16 }
  0x86   :  { %v67_v18 = vpop.f32.mrf.mxu0  ;;  %v114_v41 = vpop.permute.xlu0 %113 }
  0x87   :  { %v70_v19 = vadd.f32 %v67_v18, %v45_v17  ;;  %vm115_vm12 = vcmp.eq.s32.totalorder %v114_v41, 1 }
  0x89   :  { %v663_v20 = vmul.f32 -1.442695, %v70_v19 }
  0x8b   :  { %699 = vpow2.f32 %v663_v20 }
  0x91   :  { %v700_v21 = vpop.eup %699 }
  0x92   :  { %v74_v22 = vadd.f32 1.0, %v700_v21 }
  0x94   :  { %701 = vrcp.f32 %v74_v22  ;;  %v86_v26 = vand.u32 2147483648, %v74_v22  ;;  %v84_v28 = vand.u32 2147483647, %v74_v22  ;;  %vm80_vm6 = vweird.f32 %v74_v22 }
  0x96   :  { %v87_v30 = vor.u32 1.1754944e-38, %v86_v26  ;;  %vm85_vm8 = vcmp.eq.f32.partialorder %v84_v28, 8.507059e+37 }
  0x9a   :  { %v702_v23 = vpop.eup %701 }
  0x9b   :  { %v76_v24 = vmul.f32 %v702_v23, %v74_v22  ;;  %vm81_vm5 = vweird.f32 %v702_v23 }
  0x9c   :  { %vm82_vm7 = vmor %vm80_vm6, %vm81_vm5 }
  0x9d   :  { %v77_v25 = vsub.f32 1.0, %v76_v24 }
  0x9f   :  { %v78_v27 = vmul.f32 %v702_v23, %v77_v25 }
  0xa1   :  { %v79_v29 = vadd.f32 %v702_v23, %v78_v27  ;;  %v670_v27 = vld [vmem:[%s948_s0 + $0x18] sm:$0xff] }
  0xa2   :  { %vm245_vm9 = vcmp.eq.s32.totalorder %v670_v27, 0 }
  0xa3   :  { %v83_v31 = vsel %vm82_vm7, %v702_v23, %v79_v29  ;;  %v253_v28 = vsel %vm245_vm9, 1, %v763_v3 }
  0xa4   :  { %v88_v32 = vsel %vm85_vm8, %v87_v30, %v83_v31 }
  0xa5   :  { %91 = vrot.lane.b32.xlu1 %v88_v32, %s765_s1  ;;  %v95_v33 = vmul.f32 0.0, %v88_v32 }
  0xad   :  { %97 = vrot.lane.b32.xlu1 %v95_v33, %s766_s10 }
 0x117   :  { %v92_v34 = vpop.permute.xlu1 %91 }
 0x118   :  { %v94_v35 = vmul.f32 %v92_v34, %v88_v32 }
 0x11f   :  { %v98_v36 = vpop.permute.xlu1 %97 }
 0x120   :  { %v100_v37 = vadd.f32 %v98_v36, %v94_v35 }
 0x122   :  { %118 = vrot.lane.b32.xlu2 %v100_v37, %s767_s11 }
 0x12a   :  { %107 = vperm.xlu2 %693, %v105_v38  }
 0x17c   :  { %v119_v39 = vpop.permute.xlu2 %118 }
 0x17d   :  { %665 = vmatmul.msk.f32.vlgmr.msra.gmra.mxu1 %vm46_vm10, %v119_v39 }
 0x184   :  { %v108_v40 = vpop.permute.xlu2 %107 }
 0x185   :  { %vm109_vm11 = vcmp.eq.s32.totalorder %v108_v40, 1 }
 0x186   :  { %v110_v42 = vsel %vm109_vm11, %v829_v12, %v834_v13  ;;  %vm246_vm11 = vcmp.eq.s32.totalorder %v670_v27, 1 }
 0x187   :  { %v116_v43 = vsel %vm115_vm12, %v839_v15, %v110_v42  ;;  %v247_v29 = vsel %vm246_vm11, 1, %v763_v3 }
 0x1fa   :  { %v139_v44 = vpop.f32.mrf.mxu1 }
 0x1fb   :  { %v142_v45 = vadd.f32 %v139_v44, %v116_v43 }
 0x1fd   :  { %v666_v46 = vmul.f32 -1.442695, %v142_v45 }
 0x1ff   :  { %703 = vpow2.f32 %v666_v46 }
 0x205   :  { %v704_v47 = vpop.eup %703 }
 0x206   :  { %v146_v48 = vadd.f32 1.0, %v704_v47 }
 0x208   :  { %705 = vrcp.f32 %v146_v48  ;;  %v158_v52 = vand.u32 2147483648, %v146_v48  ;;  %v156_v54 = vand.u32 2147483647, %v146_v48  ;;  %vm152_vm14 = vweird.f32 %v146_v48 }
 0x20a   :  { %v159_v56 = vor.u32 1.1754944e-38, %v158_v52  ;;  %vm157_vm0 = vcmp.eq.f32.partialorder %v156_v54, 8.507059e+37 }
 0x20e   :  { %v706_v49 = vpop.eup %705 }
 0x20f   :  { %v148_v50 = vmul.f32 %v706_v49, %v146_v48  ;;  %vm153_vm13 = vweird.f32 %v706_v49 }
 0x210   :  { %vm154_vm15 = vmor %vm152_vm14, %vm153_vm13 }
 0x211   :  { %v149_v51 = vsub.f32 1.0, %v148_v50 }
 0x213   :  { %v150_v53 = vmul.f32 %v706_v49, %v149_v51 }
 0x215   :  { %v151_v55 = vadd.f32 %v706_v49, %v150_v53 }
 0x217   :  { %v155_v57 = vsel %vm154_vm15, %v706_v49, %v151_v55  ;;  %v673_v55 = vld [vmem:[%s948_s0 + $0x20] sm:$0xff] }
 0x218   :  { %v160_v58 = vsel %vm157_vm0, %v159_v56, %v155_v57  ;;  %vm316_vm2 = vcmp.eq.s32.totalorder %v673_v55, 0 }
 0x219   :  { %167 = vrot.lane.b32.xlu2 %v160_v58, %s766_s10  ;;  %163 = vrot.lane.b32.xlu1 %v160_v58, %s765_s1  ;;  %v324_v56 = vsel %vm316_vm2, 1, %v763_v3 }
 0x221   :  { %184 = vperm.xlu2 %693, %v182_v60   ;;  %178 = vperm.xlu1 %694, %v176_v61  }
 0x273   :  { %v168_v62 = vpop.permute.xlu2 %167 }
 0x274   :  { %v170_v0 = vmul.f32 %v168_v62, %v100_v37 }
 0x27b   :  { %v185_v6 = vpop.permute.xlu2 %184 }
 0x27c   :  { %vm186_vm4 = vcmp.eq.s32.totalorder %v185_v6, 1 }
 0x28b   :  { %v164_v63 = vpop.permute.xlu1 %163 }
 0x28c   :  { %v166_v1 = vmul.f32 %v164_v63, %v160_v58 }
 0x28e   :  { %v171_v2 = vadd.f32 %v170_v0, %v166_v1 }
 0x290   :  { %189 = vrot.lane.b32.xlu0 %v171_v2, %s767_s11 }
 0x293   :  { %v179_v5 = vpop.permute.xlu1 %178 }
 0x294   :  { %vm180_vm3 = vcmp.eq.s32.totalorder %v179_v5, 1 }
 0x295   :  { %v181_v7 = vsel %vm180_vm3, %v829_v12, %v834_v13  ;;  %vm317_vm3 = vcmp.eq.s32.totalorder %v673_v55, 1 }
 0x296   :  { %v187_v8 = vsel %vm186_vm4, %v839_v15, %v181_v7  ;;  %v318_v57 = vsel %vm317_vm3, 1, %v763_v3 }
 0x302   :  { %v190_v4 = vpop.permute.xlu0 %189 }
 0x303   :  { %668 = vmatmul.msk.f32.vlgmr.msra.gmra.mxu2 %vm46_vm10, %v190_v4 }
 0x386   :  { %v210_v9 = vpop.f32.mrf.mxu2 }
 0x387   :  { %v213_v10 = vadd.f32 %v210_v9, %v187_v8 }
 0x389   :  { %v669_v11 = vmul.f32 -1.442695, %v213_v10 }
 0x38b   :  { %707 = vpow2.f32 %v669_v11 }
 0x391   :  { %v708_v14 = vpop.eup %707 }
 0x392   :  { %v217_v16 = vadd.f32 1.0, %v708_v14 }
 0x394   :  { %709 = vrcp.f32 %v217_v16  ;;  %v229_v20 = vand.u32 2147483648, %v217_v16  ;;  %v227_v22 = vand.u32 2147483647, %v217_v16  ;;  %vm223_vm6 = vweird.f32 %v217_v16 }
 0x396   :  { %v230_v24 = vor.u32 1.1754944e-38, %v229_v20  ;;  %vm228_vm8 = vcmp.eq.f32.partialorder %v227_v22, 8.507059e+37 }
 0x39a   :  { %v710_v17 = vpop.eup %709 }
 0x39b   :  { %v219_v18 = vmul.f32 %v710_v17, %v217_v16  ;;  %vm224_vm5 = vweird.f32 %v710_v17 }
 0x39c   :  { %vm225_vm7 = vmor %vm223_vm6, %vm224_vm5 }
 0x39d   :  { %v220_v19 = vsub.f32 1.0, %v219_v18 }
 0x39f   :  { %v221_v21 = vmul.f32 %v710_v17, %v220_v19 }
 0x3a1   :  { %v222_v23 = vadd.f32 %v710_v17, %v221_v21 }
 0x3a3   :  { %v226_v25 = vsel %vm225_vm7, %v710_v17, %v222_v23  ;;  %v676_v23 = vld [vmem:[%s948_s0 + $0x28] sm:$0xff] }
 0x3a4   :  { %v231_v26 = vsel %vm228_vm8, %v230_v24, %v226_v25  ;;  %vm387_vm11 = vcmp.eq.s32.totalorder %v676_v23, 0 }
 0x3a5   :  { %238 = vrot.lane.b32.xlu1 %v231_v26, %s766_s10  ;;  %234 = vrot.lane.b32.xlu0 %v231_v26, %s765_s1  ;;  %v395_v24 = vsel %vm387_vm11, 1, %v763_v3 }
 0x3ad   :  { %255 = vperm.xlu1 %694, %v253_v28   ;;  %249 = vperm.xlu0 %692, %v247_v29  }
 0x417   :  { %v239_v30 = vpop.permute.xlu1 %238  ;;  %v235_v31 = vpop.permute.xlu0 %234 }
 0x418   :  { %v241_v32 = vmul.f32 %v239_v30, %v171_v2  ;;  %v237_v33 = vmul.f32 %v235_v31, %v231_v26 }
 0x41a   :  { %v242_v34 = vadd.f32 %v241_v32, %v237_v33 }
 0x41c   :  { %260 = vrot.lane.b32.xlu2 %v242_v34, %s767_s11 }
 0x41f   :  { %v250_v36 = vpop.permute.xlu0 %249  ;;  %v256_v37 = vpop.permute.xlu1 %255 }
 0x420   :  { %vm251_vm12 = vcmp.eq.s32.totalorder %v250_v36, 1  ;;  %vm257_vm13 = vcmp.eq.s32.totalorder %v256_v37, 1 }
 0x421   :  { %v252_v38 = vsel %vm251_vm12, %v829_v12, %v834_v13  ;;  %vm388_vm12 = vcmp.eq.s32.totalorder %v676_v23, 1 }
 0x422   :  { %v258_v39 = vsel %vm257_vm13, %v839_v15, %v252_v38  ;;  %v389_v25 = vsel %vm388_vm12, 1, %v763_v3 }
 0x476   :  { %v261_v35 = vpop.permute.xlu2 %260 }
 0x477   :  { %671 = vmatmul.msk.f32.vlgmr.msra.gmra.mxu3 %vm46_vm10, %v261_v35 }
 0x4fa   :  { %v281_v40 = vpop.f32.mrf.mxu3 }
 0x4fb   :  { %v284_v41 = vadd.f32 %v281_v40, %v258_v39 }
 0x4fd   :  { %v672_v42 = vmul.f32 -1.442695, %v284_v41 }
 0x4ff   :  { %711 = vpow2.f32 %v672_v42 }
 0x505   :  { %v712_v43 = vpop.eup %711 }
 0x506   :  { %v288_v44 = vadd.f32 1.0, %v712_v43 }
 0x508   :  { %713 = vrcp.f32 %v288_v44  ;;  %v300_v48 = vand.u32 2147483648, %v288_v44  ;;  %v298_v50 = vand.u32 2147483647, %v288_v44  ;;  %vm294_vm15 = vweird.f32 %v288_v44 }
 0x50a   :  { %v301_v52 = vor.u32 1.1754944e-38, %v300_v48  ;;  %vm299_vm1 = vcmp.eq.f32.partialorder %v298_v50, 8.507059e+37 }
 0x50e   :  { %v714_v45 = vpop.eup %713 }
 0x50f   :  { %v290_v46 = vmul.f32 %v714_v45, %v288_v44  ;;  %vm295_vm14 = vweird.f32 %v714_v45 }
 0x510   :  { %vm296_vm0 = vmor %vm294_vm15, %vm295_vm14 }
 0x511   :  { %v291_v47 = vsub.f32 1.0, %v290_v46 }
 0x513   :  { %v292_v49 = vmul.f32 %v714_v45, %v291_v47 }
 0x515   :  { %v293_v51 = vadd.f32 %v714_v45, %v292_v49 }
 0x517   :  { %v297_v53 = vsel %vm296_vm0, %v714_v45, %v293_v51  ;;  %v679_v51 = vld [vmem:[%s948_s0 + $0x30] sm:$0xff] }
 0x518   :  { %v302_v54 = vsel %vm299_vm1, %v301_v52, %v297_v53  ;;  %vm458_vm3 = vcmp.eq.s32.totalorder %v679_v51, 0 }
 0x519   :  { %309 = vrot.lane.b32.xlu0 %v302_v54, %s766_s10  ;;  %305 = vrot.lane.b32.xlu2 %v302_v54, %s765_s1  ;;  %v466_v52 = vsel %vm458_vm3, 1, %v763_v3 }
 0x521   :  { %326 = vperm.xlu0 %692, %v324_v56   ;;  %320 = vperm.xlu2 %693, %v318_v57  }
 0x573   :  { %v306_v58 = vpop.permute.xlu2 %305 }
 0x574   :  { %v308_v60 = vmul.f32 %v306_v58, %v302_v54 }
 0x57b   :  { %v321_v0 = vpop.permute.xlu2 %320 }
 0x57c   :  { %vm322_vm4 = vcmp.eq.s32.totalorder %v321_v0, 1 }
 0x57d   :  { %v323_v2 = vsel %vm322_vm4, %v829_v12, %v834_v13  ;;  %vm459_vm4 = vcmp.eq.s32.totalorder %v679_v51, 1 }
 0x57e   :  { %v460_v53 = vsel %vm459_vm4, 1, %v763_v3 }
 0x58b   :  { %v310_v59 = vpop.permute.xlu0 %309 }
 0x58c   :  { %v312_v61 = vmul.f32 %v310_v59, %v242_v34 }
 0x58e   :  { %v313_v62 = vadd.f32 %v312_v61, %v308_v60 }
 0x590   :  { %331 = vrot.lane.b32.xlu1 %v313_v62, %s767_s11 }
 0x593   :  { %v327_v1 = vpop.permute.xlu0 %326 }
 0x594   :  { %vm328_vm5 = vcmp.eq.s32.totalorder %v327_v1, 1 }
 0x595   :  { %v329_v4 = vsel %vm328_vm5, %v839_v15, %v323_v2 }
 0x602   :  { %v332_v63 = vpop.permute.xlu1 %331 }
 0x603   :  { %674 = vmatmul.msk.f32.vlgmr.msrb.gmra.mxu0 %vm46_vm10, %v332_v63 }
 0x680   :  { %v352_v5 = vpop.f32.mrf.mxu0 }
 0x681   :  { %v355_v6 = vadd.f32 %v352_v5, %v329_v4 }
 0x683   :  { %v675_v7 = vmul.f32 -1.442695, %v355_v6 }
 0x685   :  { %715 = vpow2.f32 %v675_v7 }
 0x68b   :  { %v716_v8 = vpop.eup %715 }
 0x68c   :  { %v359_v9 = vadd.f32 1.0, %v716_v8 }
 0x68e   :  { %717 = vrcp.f32 %v359_v9  ;;  %v371_v16 = vand.u32 2147483648, %v359_v9  ;;  %v369_v18 = vand.u32 2147483647, %v359_v9  ;;  %vm365_vm7 = vweird.f32 %v359_v9 }
 0x690   :  { %v372_v20 = vor.u32 1.1754944e-38, %v371_v16  ;;  %vm370_vm9 = vcmp.eq.f32.partialorder %v369_v18, 8.507059e+37 }
 0x694   :  { %v718_v10 = vpop.eup %717 }
 0x695   :  { %v361_v11 = vmul.f32 %v718_v10, %v359_v9  ;;  %vm366_vm6 = vweird.f32 %v718_v10 }
 0x696   :  { %vm367_vm8 = vmor %vm365_vm7, %vm366_vm6 }
 0x697   :  { %v362_v14 = vsub.f32 1.0, %v361_v11 }
 0x699   :  { %v363_v17 = vmul.f32 %v718_v10, %v362_v14 }
 0x69b   :  { %v364_v19 = vadd.f32 %v718_v10, %v363_v17 }
 0x69d   :  { %v368_v21 = vsel %vm367_vm8, %v718_v10, %v364_v19  ;;  %v682_v19 = vld [vmem:[%s948_s0 + $0x38] sm:$0xff] }
 0x69e   :  { %v373_v22 = vsel %vm370_vm9, %v372_v20, %v368_v21  ;;  %vm529_vm12 = vcmp.eq.s32.totalorder %v682_v19, 0 }
 0x69f   :  { %380 = vrot.lane.b32.xlu2 %v373_v22, %s766_s10  ;;  %376 = vrot.lane.b32.xlu1 %v373_v22, %s765_s1  ;;  %v537_v20 = vsel %vm529_vm12, 1, %v763_v3 }
 0x6a7   :  { %397 = vperm.xlu2 %693, %v395_v24   ;;  %391 = vperm.xlu1 %694, %v389_v25  }
 0x6f9   :  { %v381_v26 = vpop.permute.xlu2 %380 }
 0x6fa   :  { %v383_v28 = vmul.f32 %v381_v26, %v313_v62 }
 0x701   :  { %v398_v33 = vpop.permute.xlu2 %397 }
 0x702   :  { %vm399_vm14 = vcmp.eq.s32.totalorder %v398_v33, 1 }
 0x711   :  { %v377_v27 = vpop.permute.xlu1 %376 }
 0x712   :  { %v379_v29 = vmul.f32 %v377_v27, %v373_v22 }
 0x714   :  { %v384_v30 = vadd.f32 %v383_v28, %v379_v29 }
 0x716   :  { %402 = vrot.lane.b32.xlu0 %v384_v30, %s767_s11 }
 0x719   :  { %v392_v32 = vpop.permute.xlu1 %391 }
 0x71a   :  { %vm393_vm13 = vcmp.eq.s32.totalorder %v392_v32, 1 }
 0x71b   :  { %v394_v34 = vsel %vm393_vm13, %v829_v12, %v834_v13  ;;  %vm530_vm13 = vcmp.eq.s32.totalorder %v682_v19, 1 }
 0x71c   :  { %v400_v35 = vsel %vm399_vm14, %v839_v15, %v394_v34  ;;  %v531_v21 = vsel %vm530_vm13, 1, %v763_v3 }
 0x788   :  { %v403_v31 = vpop.permute.xlu0 %402 }
 0x789   :  { %677 = vmatmul.msk.f32.vlgmr.msrb.gmra.mxu1 %vm46_vm10, %v403_v31 }
 0x806   :  { %v423_v36 = vpop.f32.mrf.mxu1 }
 0x807   :  { %v426_v37 = vadd.f32 %v423_v36, %v400_v35 }
 0x809   :  { %v678_v38 = vmul.f32 -1.442695, %v426_v37 }
 0x80b   :  { %719 = vpow2.f32 %v678_v38 }
 0x811   :  { %v720_v39 = vpop.eup %719 }
 0x812   :  { %v430_v40 = vadd.f32 1.0, %v720_v39 }
 0x814   :  { %721 = vrcp.f32 %v430_v40  ;;  %v442_v44 = vand.u32 2147483648, %v430_v40  ;;  %v440_v46 = vand.u32 2147483647, %v430_v40  ;;  %vm436_vm0 = vweird.f32 %v430_v40 }
 0x816   :  { %v443_v48 = vor.u32 1.1754944e-38, %v442_v44  ;;  %vm441_vm2 = vcmp.eq.f32.partialorder %v440_v46, 8.507059e+37  ;;  %v605_v44 = vld [vmem:[%s951_s3 + $0x10] sm:$0xff]  ;;  %v603_v46 = vld [vmem:[%s951_s3] sm:$0xff] }
 0x81a   :  { %v722_v41 = vpop.eup %721 }
 0x81b   :  { %v432_v42 = vmul.f32 %v722_v41, %v430_v40  ;;  %vm437_vm15 = vweird.f32 %v722_v41 }
 0x81c   :  { %vm438_vm1 = vmor %vm436_vm0, %vm437_vm15 }
 0x81d   :  { %v433_v43 = vsub.f32 1.0, %v432_v42 }
 0x81f   :  { %v434_v45 = vmul.f32 %v722_v41, %v433_v43  ;;  %v606_v43 = vld [vmem:[%s951_s3 + $0x18] sm:$0xff] }
 0x820   :  { %628 = vmatpush.msra.mxu0 %v606_v43 }
 0x821   :  { %v435_v47 = vadd.f32 %v722_v41, %v434_v45  ;;  %v604_v45 = vld [vmem:[%s951_s3 + $0x8] sm:$0xff]  ;;  %s768_s3 = smov [#allocation2]  }
 0x822   :  { %629 = vmatpush.msra.mxu0 %v605_v44  ;;  %s652_s7 = sshll.u32 %s768_s3, 4  ;;  %s653_s7 = int_to_ptr.vmem [resolvable:$true] %s652_s7 }
 0x823   :  { %v439_v49 = vsel %vm438_vm1, %v722_v41, %v435_v47 }
 0x824   :  { %v444_v50 = vsel %vm441_vm2, %v443_v48, %v439_v49  ;;  %630 = vmatpush.msra.mxu0 %v604_v45 }
 0x825   :  { %451 = vrot.lane.b32.xlu1 %v444_v50, %s766_s10  ;;  %447 = vrot.lane.b32.xlu0 %v444_v50, %s765_s1 }
 0x826   :  { %631 = vmatpush.msra.mxu0 %v603_v46 }
 0x82d   :  { %468 = vperm.xlu1 %694, %v466_v52   ;;  %462 = vperm.xlu0 %692, %v460_v53  }
 0x897   :  { %v452_v54 = vpop.permute.xlu1 %451  ;;  %v448_v55 = vpop.permute.xlu0 %447 }
 0x898   :  { %v454_v56 = vmul.f32 %v452_v54, %v384_v30  ;;  %v450_v57 = vmul.f32 %v448_v55, %v444_v50 }
 0x89a   :  { %v455_v58 = vadd.f32 %v454_v56, %v450_v57  ;;  %v698_v56 = vld [vmem:[%s952_s4] ss:$0 sm:$0xff] }
 0x89c   :  { %473 = vrot.lane.b32.xlu2 %v455_v58, %s767_s11 }
 0x89f   :  { %v463_v60 = vpop.permute.xlu0 %462  ;;  %v469_v61 = vpop.permute.xlu1 %468 }
 0x8a0   :  { %vm464_vm5 = vcmp.eq.s32.totalorder %v463_v60, 1  ;;  %vm470_vm6 = vcmp.eq.s32.totalorder %v469_v61, 1 }
 0x8a1   :  { %v465_v62 = vsel %vm464_vm5, %v829_v12, %v834_v13 }
 0x8a2   :  { %v471_v63 = vsel %vm470_vm6, %v839_v15, %v465_v62 }
 0x8f6   :  { %v474_v59 = vpop.permute.xlu2 %473 }
 0x8f7   :  { %680 = vmatmul.msk.f32.vlgmr.msrb.gmra.mxu2 %vm46_vm10, %v474_v59 }
 0x97a   :  { %v494_v0 = vpop.f32.mrf.mxu2 }
 0x97b   :  { %v497_v1 = vadd.f32 %v494_v0, %v471_v63 }
 0x97d   :  { %v681_v2 = vmul.f32 -1.442695, %v497_v1 }
 0x97f   :  { %723 = vpow2.f32 %v681_v2 }
 0x985   :  { %v724_v4 = vpop.eup %723 }
 0x986   :  { %v501_v5 = vadd.f32 1.0, %v724_v4 }
 0x988   :  { %725 = vrcp.f32 %v501_v5  ;;  %v513_v9 = vand.u32 2147483648, %v501_v5  ;;  %v511_v11 = vand.u32 2147483647, %v501_v5  ;;  %vm507_vm8 = vweird.f32 %v501_v5 }
 0x98a   :  { %v514_v16 = vor.u32 1.1754944e-38, %v513_v9  ;;  %vm512_vm11 = vcmp.eq.f32.partialorder %v511_v11, 8.507059e+37 }
 0x98e   :  { %v726_v6 = vpop.eup %725 }
 0x98f   :  { %v503_v7 = vmul.f32 %v726_v6, %v501_v5  ;;  %vm508_vm7 = vweird.f32 %v726_v6 }
 0x990   :  { %vm509_vm9 = vmor %vm507_vm8, %vm508_vm7 }
 0x991   :  { %v504_v8 = vsub.f32 1.0, %v503_v7 }
 0x993   :  { %v505_v10 = vmul.f32 %v726_v6, %v504_v8 }
 0x995   :  { %v506_v14 = vadd.f32 %v726_v6, %v505_v10 }
 0x997   :  { %v510_v17 = vsel %vm509_vm9, %v726_v6, %v506_v14 }
 0x998   :  { %v515_v18 = vsel %vm512_vm11, %v514_v16, %v510_v17 }
 0x999   :  { %522 = vrot.lane.b32.xlu0 %v515_v18, %s766_s10  ;;  %518 = vrot.lane.b32.xlu2 %v515_v18, %s765_s1 }
 0x9a1   :  { %539 = vperm.xlu0 %692, %v537_v20   ;;  %533 = vperm.xlu2 %693, %v531_v21  }
 0x9f3   :  { %v519_v22 = vpop.permute.xlu2 %518 }
 0x9f4   :  { %v521_v24 = vmul.f32 %v519_v22, %v515_v18 }
 0x9fb   :  { %v534_v28 = vpop.permute.xlu2 %533 }
 0x9fc   :  { %vm535_vm14 = vcmp.eq.s32.totalorder %v534_v28, 1 }
 0x9fd   :  { %v536_v30 = vsel %vm535_vm14, %v829_v12, %v834_v13 }
 0xa0b   :  { %v523_v23 = vpop.permute.xlu0 %522 }
 0xa0c   :  { %v525_v25 = vmul.f32 %v523_v23, %v455_v58 }
 0xa0e   :  { %v526_v26 = vadd.f32 %v525_v25, %v521_v24 }
 0xa10   :  { %544 = vrot.lane.b32.xlu1 %v526_v26, %s767_s11 }
 0xa13   :  { %v540_v29 = vpop.permute.xlu0 %539 }
 0xa14   :  { %vm541_vm15 = vcmp.eq.s32.totalorder %v540_v29, 1 }
 0xa15   :  { %v542_v3 = vsel %vm541_vm15, %v839_v15, %v536_v30 }
 0xa82   :  { %v545_v27 = vpop.permute.xlu1 %544 }
 0xa83   :  { %683 = vmatmul.msk.f32.vlgmr.msrb.gmra.mxu3 %vm46_vm10, %v545_v27 }
 0xb06   :  { %v565_v31 = vpop.f32.mrf.mxu3 }
 0xb07   :  { %v568_v32 = vadd.f32 %v565_v31, %v542_v3 }
 0xb09   :  { %v684_v33 = vmul.f32 -1.442695, %v568_v32 }
 0xb0b   :  { %727 = vpow2.f32 %v684_v33 }
 0xb11   :  { %v728_v34 = vpop.eup %727 }
 0xb12   :  { %v572_v35 = vadd.f32 1.0, %v728_v34 }
 0xb14   :  { %729 = vrcp.f32 %v572_v35  ;;  %v584_v39 = vand.u32 2147483648, %v572_v35  ;;  %v582_v41 = vand.u32 2147483647, %v572_v35  ;;  %vm578_vm1 = vweird.f32 %v572_v35 }
 0xb16   :  { %v585_v12 = vor.u32 1.1754944e-38, %v584_v39  ;;  %vm583_vm3 = vcmp.eq.f32.partialorder %v582_v41, 8.507059e+37 }
 0xb1a   :  { %v730_v36 = vpop.eup %729 }
 0xb1b   :  { %v574_v37 = vmul.f32 %v730_v36, %v572_v35  ;;  %vm579_vm0 = vweird.f32 %v730_v36 }
 0xb1c   :  { %vm580_vm2 = vmor %vm578_vm1, %vm579_vm0 }
 0xb1d   :  { %v575_v38 = vsub.f32 1.0, %v574_v37 }
 0xb1f   :  { %v576_v40 = vmul.f32 %v730_v36, %v575_v38 }
 0xb21   :  { %v577_v42 = vadd.f32 %v730_v36, %v576_v40 }
 0xb23   :  { %v581_v13 = vsel %vm580_vm2, %v730_v36, %v577_v42 }
 0xb24   :  { %v586_v15 = vsel %vm583_vm3, %v585_v12, %v581_v13 }
 0xb25   :  { %599 = vrot.lane.b32.xlu0 %v586_v15, %s767_s11  ;;  %593 = vrot.lane.b32.xlu2 %v586_v15, %s766_s10 }
 0xb26   :  { %589 = vrot.lane.b32.xlu1 %v586_v15, %s765_s1  ;;  %s654_s1 = sshll.u32 %s953_s5, 4  ;;  %s655_s1 = int_to_ptr.hbm [resolvable:$true] %s654_s1 }
 0xb7f   :  { %v594_v47 = vpop.permute.xlu2 %593 }
 0xb80   :  { %v596_v49 = vmul.f32 %v594_v47, %v526_v26 }
 0xb97   :  { %v600_v53 = vpop.permute.xlu0 %599 }
 0xb98   :  { %v590_v48 = vpop.permute.xlu1 %589 }
 0xb99   :  { %v592_v50 = vmul.f32 %v590_v48, %v586_v15 }
 0xb9b   :  { %v597_v51 = vadd.f32 %v596_v49, %v592_v50 }
 0xb9d   :  { %731 = vtanh.f32 %v597_v51 }
 0xba3   :  { %v732_v52 = vpop.eup %731 }
 0xba4   :  { %v602_v54 = vmul.f32 %v732_v52, %v600_v53 }
 0xba6   :  { %612 = vrot.lane.b32.xlu1 %v602_v54, %s767_s11 }
 0xc18   :  { %v613_v55 = vpop.permute.xlu1 %612 }
 0xc19   :  { %685 = vmatmul.msk.f32.vlgmr.msra.gmra.mxu0 %vm46_vm10, %v613_v55 }
 0xc96   :  { %v633_v57 = vpop.f32.mrf.mxu0 }
 0xc97   :  { %v634_v58 = vadd.f32 %v698_v56, %v633_v57 }
 0xc99   :  { %636 = vmax.xlane.f32.xlu2 %v634_v58 }
 0xd0c   :  { %v637_v59 = vpop.xlane.xlu2 %636 }
 0xd0d   :  { %v638_v60 = vsub.f32 %v634_v58, %v637_v59 }
 0xd0f   :  { %v639_v61 = vmul.f32 1.442695, %v638_v60 }
 0xd11   :  { %733 = vpow2.f32 %v639_v61 }
 0xd17   :  { %v734_v62 = vpop.eup %733 }
 0xd18   :  { %641 = vadd.xlane.f32.xlu0 %v734_v62 }
 0xd8b   :  { %v642_v63 = vpop.xlane.xlu0 %641 }
 0xd8c   :  { %735 = vlog2.f32 %v642_v63 }
 0xd92   :  { %v736_v0 = vpop.eup %735 }
 0xd93   :  { %v644_v1 = vmul.f32 0.6931472, %v736_v0 }
 0xd95   :  { %v645_v2 = vsub.f32 %v638_v60, %v644_v1 }
 0xd97   :  { %646 = vst [vmem:[#allocation2] sm:$0xff] %v645_v2 }
 0xd98   :  { %657 = dma.vmem_to_hbm [thread:$0]  %s653_s7, 128, %s655_s1, [#allocation3]  }
 0xd99   :  { %761 = dma.done.wait [#allocation3], 128  }
 0xd9a   :  { %762 = vsyncadd [#allocation3], 4294967168 }
 0xd9b   :  { %662 = vsyncpa [#allocation3], 1 }

</bundles_post_ra>
